<compile_context>
chip_gen: v7x
topology: tpu7x:2x2x1
jax: 0.10.0
libtpu: 0.0.40
codegen_flags: <defaults>
</compile_context>

<pallas_src>
import functools

import jax
import jax.numpy as jnp
from jax import lax
from jax.experimental import pallas as pl
from jax.experimental.pallas import tpu as pltpu

IGNORE_INDEX = 0  # nn.CrossEntropyLoss(ignore_index=ignore_label), default ignore_label=0


def _ce_fused_kernel(lab_ref, *rest, num_maps, num_rows, tile_rows, ragged,
                     ignore_index):
    x_refs = rest[:num_maps]              # num_maps x (C, TR, 128) logits tiles
    out_ref = rest[num_maps]              # (2, 128): row 0 = NLL sum, row 1 = count
    acc_sum = rest[num_maps + 1]          # (TR, 128) f32
    acc_cnt = rest[num_maps + 2]          # (TR, 128) f32

    j = pl.program_id(1)

    @pl.when(j == 0)
    def _():
        acc_sum[...] = jnp.zeros_like(acc_sum)
        acc_cnt[...] = jnp.zeros_like(acc_cnt)

    lab = lab_ref[...]                                        # (TR, 128) int32
    valid = lab != ignore_index
    if ragged:
        # Mask rows of the last tile that fall past the end of the pixel grid.
        row = lax.broadcasted_iota(jnp.int32, lab.shape, 0) + j * tile_rows
        valid = jnp.logical_and(valid, row < num_rows)

    # One-hot label compare, shared across all maps (computed once per tile).
    onehot = lax.broadcasted_iota(jnp.int32, x_refs[0].shape, 0) == lab[None]

    # Accumulate -log p[label] over the 8 maps (unit weights) before masking.
    nll = jnp.zeros(lab.shape, jnp.float32)
    for x_ref in x_refs:                                      # unrolled (8 maps)
        x = x_ref[...].astype(jnp.float32)                    # (C, TR, 128)
        m = jnp.max(x, axis=0)                                # major-axis reduce -> VPU
        lse = jnp.log(jnp.sum(jnp.exp(x - m[None]), axis=0)) + m
        picked = jnp.sum(jnp.where(onehot, x, 0.0), axis=0)   # label gather via select
        nll = nll + (lse - picked)

    acc_sum[...] += jnp.where(valid, nll, 0.0)
    acc_cnt[...] += valid.astype(jnp.float32)                 # counted once, not 8x

    @pl.when(j == pl.num_programs(1) - 1)
    def _():
        s = jnp.sum(acc_sum[...])                             # scalar per batch row
        c = jnp.sum(acc_cnt[...])
        out_ref[...] = jnp.concatenate(
            [jnp.full((1, 128), s, jnp.float32),
             jnp.full((1, 128), c, jnp.float32)], axis=0)


def _pick_tile_rows(num_rows, num_ch, itemsize, target_block_bytes=512 * 1024):
    """Rows (of 128 lanes) per tile so one per-map logits block is ~target_block_bytes."""
    tr = target_block_bytes // (num_ch * 128 * itemsize)
    tr = max(8, (tr // 8) * 8)             # multiple of 8 (sublane tiling)
    if tr >= num_rows:
        return num_rows                    # single full-extent tile (any size allowed)
    return tr


def _ce_fused(scores, target, *, ignore_index=IGNORE_INDEX):
    """sum_m CrossEntropyLoss(ignore_index, 'mean')(scores[m], target), weights all 1."""
    num_maps = len(scores)
    N, C, H, W = scores[0].shape
    for s in scores:
        # TODO(synk): bilinear F.interpolate(align_corners=True) resize path when the
        # score and target spatial sizes differ (shapes always match in this test).
        assert s.shape == (N, C, H, W)
    assert target.shape == (N, H, W)

    HW = H * W
    # TODO(synk): pad the pixel axis (with ignore_index labels) when H*W % 128 != 0.
    assert HW % 128 == 0, "H*W must be a multiple of 128"
    R = HW // 128

    itemsize = jnp.dtype(scores[0].dtype).itemsize
    TR = _pick_tile_rows(R, C, itemsize)
    num_tiles = pl.cdiv(R, TR)
    ragged = (R % TR) != 0

    xs = [s.reshape(N, C, R, 128) for s in scores]           # free row-major reshape
    lab = target.astype(jnp.int32).reshape(N, R, 128)

    kernel = functools.partial(
        _ce_fused_kernel, num_maps=num_maps, num_rows=R, tile_rows=TR,
        ragged=ragged, ignore_index=ignore_index)

    x_spec = pl.BlockSpec((None, C, TR, 128), lambda n, j: (n, 0, j, 0))
    out = pl.pallas_call(
        kernel,
        out_shape=jax.ShapeDtypeStruct((N, 2, 128), jnp.float32),
        grid_spec=pltpu.PrefetchScalarGridSpec(
            num_scalar_prefetch=0,
            grid=(N, num_tiles),
            in_specs=[pl.BlockSpec((None, TR, 128), lambda n, j: (n, j, 0))]
                     + [x_spec] * num_maps,
            out_specs=pl.BlockSpec((None, 2, 128), lambda n, j: (n, 0, 0)),
            scratch_shapes=[
                pltpu.VMEM((TR, 128), jnp.float32),   # dense NLL accumulator
                pltpu.VMEM((TR, 128), jnp.float32),   # dense valid-count accumulator
            ],
        ),
        compiler_params=pltpu.CompilerParams(
            # Batch rows are independent (megacore-parallel on v7x); the pixel-tile
            # axis is the reduction into the per-row accumulators.
            dimension_semantics=("parallel", "arbitrary"),
            # ~8-9 MiB of double-buffered blocks at the default tile target; raise
            # the scoped limit explicitly so v5e's 16 MiB default never bites.
            vmem_limit_bytes=32 * 1024 * 1024,
        ),
    )(lab, *xs)

    total = jnp.sum(out[:, 0, 0])       # sum over maps and batch rows of masked NLL
    count = jnp.sum(out[:, 1, 0])       # valid pixels (shared denominator, weights=1)
    return total / count


def cross_entropy(scores, target, *, ignore_index=IGNORE_INDEX):
    """Matches CrossEntropy.forward: sum of unit-weighted CE over the 8 score maps."""
    weights = [1] * 8
    assert len(weights) == len(scores)
    # All weights are 1, so sum_m (S_m / count) == (sum_m S_m) / count and all 8
    # maps fuse into a single pallas_call that reads the labels from HBM once.
    return _ce_fused(list(scores), target, ignore_index=ignore_index)


def _reference(scores, target, ignore_index=IGNORE_INDEX):
    lab = target.astype(jnp.int32)
    valid = (lab != ignore_index).astype(jnp.float32)
    total = jnp.float32(0.0)
    for s in scores:
        logp = jax.nn.log_softmax(s.astype(jnp.float32), axis=1)          # (N,C,H,W)
        picked = jnp.take_along_axis(logp, lab[:, None, :, :], axis=1)[:, 0]
        total = total + jnp.sum(-picked * valid) / jnp.sum(valid)
    return total


if __name__ == "__main__":
    key = jax.random.PRNGKey(0)
    N, C, H, W = 2, 4, 16, 16
    k_lab, *k_scores = jax.random.split(key, 9)

    scores = [jax.random.normal(k, (N, C, H, W), dtype=jnp.float32) for k in k_scores]
    target = jax.random.randint(k_lab, (N, H, W), 0, C, dtype=jnp.int32)

    loss = jax.jit(cross_entropy)(scores, target)
    loss = jax.block_until_ready(loss)

    ref = _reference(scores, target)
    assert jnp.allclose(loss, ref, rtol=1e-5, atol=1e-5), (loss, ref)

    print("KERNEL_OK")
</pallas_src>

<mosaic_0001>
module attributes {stable_mosaic.version = 11 : i64} {
  func.func @_ce_fused_kernel(%arg0: i32, %arg1: i32, %arg2: memref<1x2x128xi32, #tpu.memory_space<vmem>>, %arg3: memref<1x4x2x128xf32, #tpu.memory_space<vmem>>, %arg4: memref<1x4x2x128xf32, #tpu.memory_space<vmem>>, %arg5: memref<1x4x2x128xf32, #tpu.memory_space<vmem>>, %arg6: memref<1x4x2x128xf32, #tpu.memory_space<vmem>>, %arg7: memref<1x4x2x128xf32, #tpu.memory_space<vmem>>, %arg8: memref<1x4x2x128xf32, #tpu.memory_space<vmem>>, %arg9: memref<1x4x2x128xf32, #tpu.memory_space<vmem>>, %arg10: memref<1x4x2x128xf32, #tpu.memory_space<vmem>>, %arg11: memref<1x2x128xf32, #tpu.memory_space<vmem>>, %arg12: memref<2x128xf32, #tpu.memory_space<vmem>>, %arg13: memref<2x128xf32, #tpu.memory_space<vmem>>) attributes {dimension_semantics = [#tpu.dimension_semantics<parallel>, #tpu.dimension_semantics<arbitrary>], iteration_bounds = array<i64: 2, 1>, scalar_prefetch = 0 : i64, scratch_operands = 2 : i64, tpu.core_type = #tpu.core_type<tc>, window_params = [{transform_indices = @transform_0, window_bounds = array<i64: 1, 2, 128>}, {transform_indices = @transform_1, window_bounds = array<i64: 1, 4, 2, 128>}, {transform_indices = @transform_2, window_bounds = array<i64: 1, 4, 2, 128>}, {transform_indices = @transform_3, window_bounds = array<i64: 1, 4, 2, 128>}, {transform_indices = @transform_4, window_bounds = array<i64: 1, 4, 2, 128>}, {transform_indices = @transform_5, window_bounds = array<i64: 1, 4, 2, 128>}, {transform_indices = @transform_6, window_bounds = array<i64: 1, 4, 2, 128>}, {transform_indices = @transform_7, window_bounds = array<i64: 1, 4, 2, 128>}, {transform_indices = @transform_8, window_bounds = array<i64: 1, 4, 2, 128>}, {transform_indices = @transform_9, window_bounds = array<i64: 1, 2, 128>}]} {
    %c0_i32 = arith.constant 0 : i32
    %0 = arith.cmpi eq, %arg1, %c0_i32 : i32
    %1 = arith.extui %0 : i1 to i32
    %c0_i32_0 = arith.constant 0 : i32
    %2 = arith.cmpi ne, %1, %c0_i32_0 : i32
    scf.if %2 {
      %cst_79 = arith.constant 0.000000e+00 : f32
      %145 = vector.broadcast %cst_79 : f32 to vector<2x128xf32>
      %c0_80 = arith.constant 0 : index
      %c0_81 = arith.constant 0 : index
      %146 = vector.load %arg12[%c0_80, %c0_81] : memref<2x128xf32, #tpu.memory_space<vmem>>, vector<2x128xf32>
      tpu.vector_store %arg12[%c0_80, %c0_81], %145 {strides = array<i32>} : memref<2x128xf32, #tpu.memory_space<vmem>>, vector<2x128xf32>,
      %cst_82 = arith.constant 0.000000e+00 : f32
      %147 = vector.broadcast %cst_82 : f32 to vector<2x128xf32>
      %c0_83 = arith.constant 0 : index
      %c0_84 = arith.constant 0 : index
      %148 = vector.load %arg13[%c0_83, %c0_84] : memref<2x128xf32, #tpu.memory_space<vmem>>, vector<2x128xf32>
      tpu.vector_store %arg13[%c0_83, %c0_84], %147 {strides = array<i32>} : memref<2x128xf32, #tpu.memory_space<vmem>>, vector<2x128xf32>,
    } else {
    }
    %c0 = arith.constant 0 : index
    %c0_1 = arith.constant 0 : index
    %c0_2 = arith.constant 0 : index
    %3 = vector.load %arg2[%c0, %c0_1, %c0_2] : memref<1x2x128xi32, #tpu.memory_space<vmem>>, vector<1x2x128xi32>
    %4 = vector.shape_cast %3 : vector<1x2x128xi32> to vector<2x128xi32>
    %c0_i32_3 = arith.constant 0 : i32
    %5 = vector.broadcast %c0_i32_3 : i32 to vector<2x128xi32>
    %6 = arith.cmpi ne, %4, %5 : vector<2x128xi32>
    %7 = tpu.iota {dimensions = array<i32: 0>} : vector<4x2x128xi32>
    %8 = vector.shape_cast %4 : vector<2x128xi32> to vector<1x2x128xi32>
    %9 = vector.broadcast %8 : vector<1x2x128xi32> to vector<4x2x128xi32>
    %10 = arith.cmpi eq, %7, %9 : vector<4x2x128xi32>
    %cst = arith.constant 0.000000e+00 : f32
    %11 = vector.broadcast %cst : f32 to vector<2x128xf32>
    %c0_4 = arith.constant 0 : index
    %c0_5 = arith.constant 0 : index
    %c0_6 = arith.constant 0 : index
    %c0_7 = arith.constant 0 : index
    %12 = vector.load %arg3[%c0_4, %c0_5, %c0_6, %c0_7] : memref<1x4x2x128xf32, #tpu.memory_space<vmem>>, vector<1x4x2x128xf32>
    %13 = vector.shape_cast %12 : vector<1x4x2x128xf32> to vector<4x2x128xf32>
    %cst_8 = arith.constant dense<0xFF800000> : vector<2x128xf32>
    %14 = vector.multi_reduction <maximumf>, %13, %cst_8 [0] : vector<4x2x128xf32> to vector<2x128xf32>
    %15 = vector.shape_cast %14 : vector<2x128xf32> to vector<1x2x128xf32>
    %16 = vector.broadcast %15 : vector<1x2x128xf32> to vector<4x2x128xf32>
    %17 = arith.subf %13, %16 : vector<4x2x128xf32>
    %18 = math.exp %17 : vector<4x2x128xf32>
    %cst_9 = arith.constant dense<0.000000e+00> : vector<2x128xf32>
    %19 = vector.multi_reduction <add>, %18, %cst_9 [0] : vector<4x2x128xf32> to vector<2x128xf32>
    %20 = math.log %19 : vector<2x128xf32>
    %21 = arith.addf %20, %14 : vector<2x128xf32>
    %cst_10 = arith.constant 0.000000e+00 : f32
    %22 = vector.broadcast %cst_10 : f32 to vector<4x2x128xf32>
    %23 = arith.select %10, %13, %22 : vector<4x2x128xi1>, vector<4x2x128xf32>
    %cst_11 = arith.constant dense<0.000000e+00> : vector<2x128xf32>
    %24 = vector.multi_reduction <add>, %23, %cst_11 [0] : vector<4x2x128xf32> to vector<2x128xf32>
    %25 = arith.subf %21, %24 : vector<2x128xf32>
    %26 = arith.addf %11, %25 : vector<2x128xf32>
    %c0_12 = arith.constant 0 : index
    %c0_13 = arith.constant 0 : index
    %c0_14 = arith.constant 0 : index
    %c0_15 = arith.constant 0 : index
    %27 = vector.load %arg4[%c0_12, %c0_13, %c0_14, %c0_15] : memref<1x4x2x128xf32, #tpu.memory_space<vmem>>, vector<1x4x2x128xf32>
    %28 = vector.shape_cast %27 : vector<1x4x2x128xf32> to vector<4x2x128xf32>
    %cst_16 = arith.constant dense<0xFF800000> : vector<2x128xf32>
    %29 = vector.multi_reduction <maximumf>, %28, %cst_16 [0] : vector<4x2x128xf32> to vector<2x128xf32>
    %30 = vector.shape_cast %29 : vector<2x128xf32> to vector<1x2x128xf32>
    %31 = vector.broadcast %30 : vector<1x2x128xf32> to vector<4x2x128xf32>
    %32 = arith.subf %28, %31 : vector<4x2x128xf32>
    %33 = math.exp %32 : vector<4x2x128xf32>
    %cst_17 = arith.constant dense<0.000000e+00> : vector<2x128xf32>
    %34 = vector.multi_reduction <add>, %33, %cst_17 [0] : vector<4x2x128xf32> to vector<2x128xf32>
    %35 = math.log %34 : vector<2x128xf32>
    %36 = arith.addf %35, %29 : vector<2x128xf32>
    %cst_18 = arith.constant 0.000000e+00 : f32
    %37 = vector.broadcast %cst_18 : f32 to vector<4x2x128xf32>
    %38 = arith.select %10, %28, %37 : vector<4x2x128xi1>, vector<4x2x128xf32>
    %cst_19 = arith.constant dense<0.000000e+00> : vector<2x128xf32>
    %39 = vector.multi_reduction <add>, %38, %cst_19 [0] : vector<4x2x128xf32> to vector<2x128xf32>
    %40 = arith.subf %36, %39 : vector<2x128xf32>
    %41 = arith.addf %26, %40 : vector<2x128xf32>
    %c0_20 = arith.constant 0 : index
    %c0_21 = arith.constant 0 : index
    %c0_22 = arith.constant 0 : index
    %c0_23 = arith.constant 0 : index
    %42 = vector.load %arg5[%c0_20, %c0_21, %c0_22, %c0_23] : memref<1x4x2x128xf32, #tpu.memory_space<vmem>>, vector<1x4x2x128xf32>
    %43 = vector.shape_cast %42 : vector<1x4x2x128xf32> to vector<4x2x128xf32>
    %cst_24 = arith.constant dense<0xFF800000> : vector<2x128xf32>
    %44 = vector.multi_reduction <maximumf>, %43, %cst_24 [0] : vector<4x2x128xf32> to vector<2x128xf32>
    %45 = vector.shape_cast %44 : vector<2x128xf32> to vector<1x2x128xf32>
    %46 = vector.broadcast %45 : vector<1x2x128xf32> to vector<4x2x128xf32>
    %47 = arith.subf %43, %46 : vector<4x2x128xf32>
    %48 = math.exp %47 : vector<4x2x128xf32>
    %cst_25 = arith.constant dense<0.000000e+00> : vector<2x128xf32>
    %49 = vector.multi_reduction <add>, %48, %cst_25 [0] : vector<4x2x128xf32> to vector<2x128xf32>
    %50 = math.log %49 : vector<2x128xf32>
    %51 = arith.addf %50, %44 : vector<2x128xf32>
    %cst_26 = arith.constant 0.000000e+00 : f32
    %52 = vector.broadcast %cst_26 : f32 to vector<4x2x128xf32>
    %53 = arith.select %10, %43, %52 : vector<4x2x128xi1>, vector<4x2x128xf32>
    %cst_27 = arith.constant dense<0.000000e+00> : vector<2x128xf32>
    %54 = vector.multi_reduction <add>, %53, %cst_27 [0] : vector<4x2x128xf32> to vector<2x128xf32>
    %55 = arith.subf %51, %54 : vector<2x128xf32>
    %56 = arith.addf %41, %55 : vector<2x128xf32>
    %c0_28 = arith.constant 0 : index
    %c0_29 = arith.constant 0 : index
    %c0_30 = arith.constant 0 : index
    %c0_31 = arith.constant 0 : index
    %57 = vector.load %arg6[%c0_28, %c0_29, %c0_30, %c0_31] : memref<1x4x2x128xf32, #tpu.memory_space<vmem>>, vector<1x4x2x128xf32>
    %58 = vector.shape_cast %57 : vector<1x4x2x128xf32> to vector<4x2x128xf32>
    %cst_32 = arith.constant dense<0xFF800000> : vector<2x128xf32>
    %59 = vector.multi_reduction <maximumf>, %58, %cst_32 [0] : vector<4x2x128xf32> to vector<2x128xf32>
    %60 = vector.shape_cast %59 : vector<2x128xf32> to vector<1x2x128xf32>
    %61 = vector.broadcast %60 : vector<1x2x128xf32> to vector<4x2x128xf32>
    %62 = arith.subf %58, %61 : vector<4x2x128xf32>
    %63 = math.exp %62 : vector<4x2x128xf32>
    %cst_33 = arith.constant dense<0.000000e+00> : vector<2x128xf32>
    %64 = vector.multi_reduction <add>, %63, %cst_33 [0] : vector<4x2x128xf32> to vector<2x128xf32>
    %65 = math.log %64 : vector<2x128xf32>
    %66 = arith.addf %65, %59 : vector<2x128xf32>
    %cst_34 = arith.constant 0.000000e+00 : f32
    %67 = vector.broadcast %cst_34 : f32 to vector<4x2x128xf32>
    %68 = arith.select %10, %58, %67 : vector<4x2x128xi1>, vector<4x2x128xf32>
    %cst_35 = arith.constant dense<0.000000e+00> : vector<2x128xf32>
    %69 = vector.multi_reduction <add>, %68, %cst_35 [0] : vector<4x2x128xf32> to vector<2x128xf32>
    %70 = arith.subf %66, %69 : vector<2x128xf32>
    %71 = arith.addf %56, %70 : vector<2x128xf32>
    %c0_36 = arith.constant 0 : index
    %c0_37 = arith.constant 0 : index
    %c0_38 = arith.constant 0 : index
    %c0_39 = arith.constant 0 : index
    %72 = vector.load %arg7[%c0_36, %c0_37, %c0_38, %c0_39] : memref<1x4x2x128xf32, #tpu.memory_space<vmem>>, vector<1x4x2x128xf32>
    %73 = vector.shape_cast %72 : vector<1x4x2x128xf32> to vector<4x2x128xf32>
    %cst_40 = arith.constant dense<0xFF800000> : vector<2x128xf32>
    %74 = vector.multi_reduction <maximumf>, %73, %cst_40 [0] : vector<4x2x128xf32> to vector<2x128xf32>
    %75 = vector.shape_cast %74 : vector<2x128xf32> to vector<1x2x128xf32>
    %76 = vector.broadcast %75 : vector<1x2x128xf32> to vector<4x2x128xf32>
    %77 = arith.subf %73, %76 : vector<4x2x128xf32>
    %78 = math.exp %77 : vector<4x2x128xf32>
    %cst_41 = arith.constant dense<0.000000e+00> : vector<2x128xf32>
    %79 = vector.multi_reduction <add>, %78, %cst_41 [0] : vector<4x2x128xf32> to vector<2x128xf32>
    %80 = math.log %79 : vector<2x128xf32>
    %81 = arith.addf %80, %74 : vector<2x128xf32>
    %cst_42 = arith.constant 0.000000e+00 : f32
    %82 = vector.broadcast %cst_42 : f32 to vector<4x2x128xf32>
    %83 = arith.select %10, %73, %82 : vector<4x2x128xi1>, vector<4x2x128xf32>
    %cst_43 = arith.constant dense<0.000000e+00> : vector<2x128xf32>
    %84 = vector.multi_reduction <add>, %83, %cst_43 [0] : vector<4x2x128xf32> to vector<2x128xf32>
    %85 = arith.subf %81, %84 : vector<2x128xf32>
    %86 = arith.addf %71, %85 : vector<2x128xf32>
    %c0_44 = arith.constant 0 : index
    %c0_45 = arith.constant 0 : index
    %c0_46 = arith.constant 0 : index
    %c0_47 = arith.constant 0 : index
    %87 = vector.load %arg8[%c0_44, %c0_45, %c0_46, %c0_47] : memref<1x4x2x128xf32, #tpu.memory_space<vmem>>, vector<1x4x2x128xf32>
    %88 = vector.shape_cast %87 : vector<1x4x2x128xf32> to vector<4x2x128xf32>
    %cst_48 = arith.constant dense<0xFF800000> : vector<2x128xf32>
    %89 = vector.multi_reduction <maximumf>, %88, %cst_48 [0] : vector<4x2x128xf32> to vector<2x128xf32>
    %90 = vector.shape_cast %89 : vector<2x128xf32> to vector<1x2x128xf32>
    %91 = vector.broadcast %90 : vector<1x2x128xf32> to vector<4x2x128xf32>
    %92 = arith.subf %88, %91 : vector<4x2x128xf32>
    %93 = math.exp %92 : vector<4x2x128xf32>
    %cst_49 = arith.constant dense<0.000000e+00> : vector<2x128xf32>
    %94 = vector.multi_reduction <add>, %93, %cst_49 [0] : vector<4x2x128xf32> to vector<2x128xf32>
    %95 = math.log %94 : vector<2x128xf32>
    %96 = arith.addf %95, %89 : vector<2x128xf32>
    %cst_50 = arith.constant 0.000000e+00 : f32
    %97 = vector.broadcast %cst_50 : f32 to vector<4x2x128xf32>
    %98 = arith.select %10, %88, %97 : vector<4x2x128xi1>, vector<4x2x128xf32>
    %cst_51 = arith.constant dense<0.000000e+00> : vector<2x128xf32>
    %99 = vector.multi_reduction <add>, %98, %cst_51 [0] : vector<4x2x128xf32> to vector<2x128xf32>
    %100 = arith.subf %96, %99 : vector<2x128xf32>
    %101 = arith.addf %86, %100 : vector<2x128xf32>
    %c0_52 = arith.constant 0 : index
    %c0_53 = arith.constant 0 : index
    %c0_54 = arith.constant 0 : index
    %c0_55 = arith.constant 0 : index
    %102 = vector.load %arg9[%c0_52, %c0_53, %c0_54, %c0_55] : memref<1x4x2x128xf32, #tpu.memory_space<vmem>>, vector<1x4x2x128xf32>
    %103 = vector.shape_cast %102 : vector<1x4x2x128xf32> to vector<4x2x128xf32>
    %cst_56 = arith.constant dense<0xFF800000> : vector<2x128xf32>
    %104 = vector.multi_reduction <maximumf>, %103, %cst_56 [0] : vector<4x2x128xf32> to vector<2x128xf32>
    %105 = vector.shape_cast %104 : vector<2x128xf32> to vector<1x2x128xf32>
    %106 = vector.broadcast %105 : vector<1x2x128xf32> to vector<4x2x128xf32>
    %107 = arith.subf %103, %106 : vector<4x2x128xf32>
    %108 = math.exp %107 : vector<4x2x128xf32>
    %cst_57 = arith.constant dense<0.000000e+00> : vector<2x128xf32>
    %109 = vector.multi_reduction <add>, %108, %cst_57 [0] : vector<4x2x128xf32> to vector<2x128xf32>
    %110 = math.log %109 : vector<2x128xf32>
    %111 = arith.addf %110, %104 : vector<2x128xf32>
    %cst_58 = arith.constant 0.000000e+00 : f32
    %112 = vector.broadcast %cst_58 : f32 to vector<4x2x128xf32>
    %113 = arith.select %10, %103, %112 : vector<4x2x128xi1>, vector<4x2x128xf32>
    %cst_59 = arith.constant dense<0.000000e+00> : vector<2x128xf32>
    %114 = vector.multi_reduction <add>, %113, %cst_59 [0] : vector<4x2x128xf32> to vector<2x128xf32>
    %115 = arith.subf %111, %114 : vector<2x128xf32>
    %116 = arith.addf %101, %115 : vector<2x128xf32>
    %c0_60 = arith.constant 0 : index
    %c0_61 = arith.constant 0 : index
    %c0_62 = arith.constant 0 : index
    %c0_63 = arith.constant 0 : index
    %117 = vector.load %arg10[%c0_60, %c0_61, %c0_62, %c0_63] : memref<1x4x2x128xf32, #tpu.memory_space<vmem>>, vector<1x4x2x128xf32>
    %118 = vector.shape_cast %117 : vector<1x4x2x128xf32> to vector<4x2x128xf32>
    %cst_64 = arith.constant dense<0xFF800000> : vector<2x128xf32>
    %119 = vector.multi_reduction <maximumf>, %118, %cst_64 [0] : vector<4x2x128xf32> to vector<2x128xf32>
    %120 = vector.shape_cast %119 : vector<2x128xf32> to vector<1x2x128xf32>
    %121 = vector.broadcast %120 : vector<1x2x128xf32> to vector<4x2x128xf32>
    %122 = arith.subf %118, %121 : vector<4x2x128xf32>
    %123 = math.exp %122 : vector<4x2x128xf32>
    %cst_65 = arith.constant dense<0.000000e+00> : vector<2x128xf32>
    %124 = vector.multi_reduction <add>, %123, %cst_65 [0] : vector<4x2x128xf32> to vector<2x128xf32>
    %125 = math.log %124 : vector<2x128xf32>
    %126 = arith.addf %125, %119 : vector<2x128xf32>
    %cst_66 = arith.constant 0.000000e+00 : f32
    %127 = vector.broadcast %cst_66 : f32 to vector<4x2x128xf32>
    %128 = arith.select %10, %118, %127 : vector<4x2x128xi1>, vector<4x2x128xf32>
    %cst_67 = arith.constant dense<0.000000e+00> : vector<2x128xf32>
    %129 = vector.multi_reduction <add>, %128, %cst_67 [0] : vector<4x2x128xf32> to vector<2x128xf32>
    %130 = arith.subf %126, %129 : vector<2x128xf32>
    %131 = arith.addf %116, %130 : vector<2x128xf32>
    %c0_68 = arith.constant 0 : index
    %c0_69 = arith.constant 0 : index
    %132 = vector.load %arg12[%c0_68, %c0_69] : memref<2x128xf32, #tpu.memory_space<vmem>>, vector<2x128xf32>
    %cst_70 = arith.constant 0.000000e+00 : f32
    %133 = vector.broadcast %cst_70 : f32 to vector<2x128xf32>
    %134 = arith.select %6, %131, %133 : vector<2x128xi1>, vector<2x128xf32>
    %135 = arith.addf %132, %134 : vector<2x128xf32>
    %c0_71 = arith.constant 0 : index
    %c0_72 = arith.constant 0 : index
    %136 = vector.load %arg12[%c0_71, %c0_72] : memref<2x128xf32, #tpu.memory_space<vmem>>, vector<2x128xf32>
    tpu.vector_store %arg12[%c0_71, %c0_72], %135 {strides = array<i32>} : memref<2x128xf32, #tpu.memory_space<vmem>>, vector<2x128xf32>,
    %c0_73 = arith.constant 0 : index
    %c0_74 = arith.constant 0 : index
    %137 = vector.load %arg13[%c0_73, %c0_74] : memref<2x128xf32, #tpu.memory_space<vmem>>, vector<2x128xf32>
    %138 = arith.extui %6 : vector<2x128xi1> to vector<2x128xi32>
    %139 = arith.sitofp %138 : vector<2x128xi32> to vector<2x128xf32>
    %140 = arith.addf %137, %139 : vector<2x128xf32>
    %c0_75 = arith.constant 0 : index
    %c0_76 = arith.constant 0 : index
    %141 = vector.load %arg13[%c0_75, %c0_76] : memref<2x128xf32, #tpu.memory_space<vmem>>, vector<2x128xf32>
    tpu.vector_store %arg13[%c0_75, %c0_76], %140 {strides = array<i32>} : memref<2x128xf32, #tpu.memory_space<vmem>>, vector<2x128xf32>,
    %c0_i32_77 = arith.constant 0 : i32
    %142 = arith.cmpi eq, %arg1, %c0_i32_77 : i32
    %143 = arith.extui %142 : i1 to i32
    %c0_i32_78 = arith.constant 0 : i32
    %144 = arith.cmpi ne, %143, %c0_i32_78 : i32
    scf.if %144 {
      %c0_79 = arith.constant 0 : index
      %c0_80 = arith.constant 0 : index
      %145 = vector.load %arg12[%c0_79, %c0_80] : memref<2x128xf32, #tpu.memory_space<vmem>>, vector<2x128xf32>
      %146 = vector.shape_cast %145 : vector<2x128xf32> to vector<1x2x128xf32>
      %cst_81 = arith.constant dense<0.000000e+00> : vector<1xf32>
      %147 = vector.multi_reduction <add>, %146, %cst_81 [1, 2] : vector<1x2x128xf32> to vector<1xf32>
      %148 = vector.shape_cast %147 : vector<1xf32> to vector<1x1x1xf32>
      %149 = vector.extract %148[0, 0, 0] : f32 from vector<1x1x1xf32>
      %c0_82 = arith.constant 0 : index
      %c0_83 = arith.constant 0 : index
      %150 = vector.load %arg13[%c0_82, %c0_83] : memref<2x128xf32, #tpu.memory_space<vmem>>, vector<2x128xf32>
      %151 = vector.shape_cast %150 : vector<2x128xf32> to vector<1x2x128xf32>
      %cst_84 = arith.constant dense<0.000000e+00> : vector<1xf32>
      %152 = vector.multi_reduction <add>, %151, %cst_84 [1, 2] : vector<1x2x128xf32> to vector<1xf32>
      %153 = vector.shape_cast %152 : vector<1xf32> to vector<1x1x1xf32>
      %154 = vector.extract %153[0, 0, 0] : f32 from vector<1x1x1xf32>
      %155 = vector.broadcast %149 : f32 to vector<1x128xf32>
      %156 = vector.broadcast %154 : f32 to vector<1x128xf32>
      %157 = tpu.concatenate %155, %156 in 0 : vector<1x128xf32>, vector<1x128xf32> -> vector<2x128xf32>
      %c0_85 = arith.constant 0 : index
      %c0_86 = arith.constant 0 : index
      %c0_87 = arith.constant 0 : index
      %158 = vector.load %arg11[%c0_85, %c0_86, %c0_87] : memref<1x2x128xf32, #tpu.memory_space<vmem>>, vector<1x2x128xf32>
      %159 = vector.shape_cast %158 : vector<1x2x128xf32> to vector<2x128xf32>
      %160 = vector.shape_cast %157 : vector<2x128xf32> to vector<1x2x128xf32>
      tpu.vector_store %arg11[%c0_85, %c0_86, %c0_87], %160 {strides = array<i32>} : memref<1x2x128xf32, #tpu.memory_space<vmem>>, vector<1x2x128xf32>,
    } else {
    }
    return
  }
  func.func @transform_0(%arg0: i32, %arg1: i32) -> (i32, i32, i32) {
    %c0_i32 = arith.constant 0 : i32
    %c0_i32_0 = arith.constant 0 : i32
    return %arg0, %arg1, %c0_i32 : i32, i32, i32
  }
  func.func @transform_1(%arg0: i32, %arg1: i32) -> (i32, i32, i32, i32) {
    %c0_i32 = arith.constant 0 : i32
    %c0_i32_0 = arith.constant 0 : i32
    %c0_i32_1 = arith.constant 0 : i32
    return %arg0, %c0_i32, %arg1, %c0_i32_0 : i32, i32, i32, i32
  }
  func.func @transform_2(%arg0: i32, %arg1: i32) -> (i32, i32, i32, i32) {
    %c0_i32 = arith.constant 0 : i32
    %c0_i32_0 = arith.constant 0 : i32
    %c0_i32_1 = arith.constant 0 : i32
    return %arg0, %c0_i32, %arg1, %c0_i32_0 : i32, i32, i32, i32
  }
  func.func @transform_3(%arg0: i32, %arg1: i32) -> (i32, i32, i32, i32) {
    %c0_i32 = arith.constant 0 : i32
    %c0_i32_0 = arith.constant 0 : i32
    %c0_i32_1 = arith.constant 0 : i32
    return %arg0, %c0_i32, %arg1, %c0_i32_0 : i32, i32, i32, i32
  }
  func.func @transform_4(%arg0: i32, %arg1: i32) -> (i32, i32, i32, i32) {
    %c0_i32 = arith.constant 0 : i32
    %c0_i32_0 = arith.constant 0 : i32
    %c0_i32_1 = arith.constant 0 : i32
    return %arg0, %c0_i32, %arg1, %c0_i32_0 : i32, i32, i32, i32
  }
  func.func @transform_5(%arg0: i32, %arg1: i32) -> (i32, i32, i32, i32) {
    %c0_i32 = arith.constant 0 : i32
    %c0_i32_0 = arith.constant 0 : i32
    %c0_i32_1 = arith.constant 0 : i32
    return %arg0, %c0_i32, %arg1, %c0_i32_0 : i32, i32, i32, i32
  }
  func.func @transform_6(%arg0: i32, %arg1: i32) -> (i32, i32, i32, i32) {
    %c0_i32 = arith.constant 0 : i32
    %c0_i32_0 = arith.constant 0 : i32
    %c0_i32_1 = arith.constant 0 : i32
    return %arg0, %c0_i32, %arg1, %c0_i32_0 : i32, i32, i32, i32
  }
  func.func @transform_7(%arg0: i32, %arg1: i32) -> (i32, i32, i32, i32) {
    %c0_i32 = arith.constant 0 : i32
    %c0_i32_0 = arith.constant 0 : i32
    %c0_i32_1 = arith.constant 0 : i32
    return %arg0, %c0_i32, %arg1, %c0_i32_0 : i32, i32, i32, i32
  }
  func.func @transform_8(%arg0: i32, %arg1: i32) -> (i32, i32, i32, i32) {
    %c0_i32 = arith.constant 0 : i32
    %c0_i32_0 = arith.constant 0 : i32
    %c0_i32_1 = arith.constant 0 : i32
    return %arg0, %c0_i32, %arg1, %c0_i32_0 : i32, i32, i32, i32
  }
  func.func @transform_9(%arg0: i32, %arg1: i32) -> (i32, i32, i32) {
    %c0_i32 = arith.constant 0 : i32
    %c0_i32_0 = arith.constant 0 : i32
    %c0_i32_1 = arith.constant 0 : i32
    return %arg0, %c0_i32, %c0_i32_0 : i32, i32, i32
  }
}

</mosaic_0001>

<bundles_post_ra>
// kernel: cross_entropy.1
= control target key start
LH: loop header
LB: loop body
LE: loop exit
PB: predicated region body
PF: predicated region fallthrough
CT: control target
= control target key end

     0   :  { %s1445_s30 = smov 0   ;;  %s1447_s10 = smov 0   ;;  %s1924_s0 = inlined_call_operand.vmem [shape: s32[2,2,128], index: 0, kind: input, shape index: {}]   ;;  %s1925_s1 = inlined_call_operand.vmem [shape: f32[2,4,2,128], index: 1, kind: input, shape index: {}]   ;;  %s1926_s2 = inlined_call_operand.vmem [shape: f32[2,4,2,128], index: 2, kind: input, shape index: {}]   ;;  %s1927_s3 = inlined_call_operand.vmem [shape: f32[2,4,2,128], index: 3, kind: input, shape index: {}]   ;;  %s1928_s4 = inlined_call_operand.vmem [shape: f32[2,4,2,128], index: 4, kind: input, shape index: {}]   ;;  %s1929_s5 = inlined_call_operand.vmem [shape: f32[2,4,2,128], index: 5, kind: input, shape index: {}]   ;;  %s1930_s6 = inlined_call_operand.vmem [shape: f32[2,4,2,128], index: 6, kind: input, shape index: {}]   ;;  %s1931_s7 = inlined_call_operand.vmem [shape: f32[2,4,2,128], index: 7, kind: input, shape index: {}]   ;;  %s1932_s8 = inlined_call_operand.vmem [shape: f32[2,4,2,128], index: 8, kind: input, shape index: {}]   ;;  %s1933_s9 = inlined_call_operand.vmem [shape: f32[2,2,128], index: 9, kind: output, shape index: {}]  }
   0x1   :  { %s1449_s11 = smov 0  }
   0x2 LB: > { %s31_s12 = sadd.s32 1, %s1388_s10  ;;  %p1231_p0 = scmp.ge.s32.totalorder %s1392_s11, 1  ;;  %s1392_s11 = sphi %s1449_s11, %s19_s11   ;;  %s1388_s10 = sphi %s1447_s10, %s1935_s10   ;;  %s1384_s30 = sphi %s1445_s30, %s1934_s30  }
   0x3   : > { %p33_p1 = scmp.ge.s32.totalorder %s31_s12, 2  ;;  %p423_p2 = scmp.lt.s32.totalorder %s1392_s11, 3 }
   0x5   : > { %s1937_s12 = smov (%p33_p1, %s31_s12), 0  ;;  %p424_p3 = pnand %p1231_p0, %p423_p2 }
   0x6   : > { %p524_p4 = scmp.lt.s32.totalorder (!%p424_p3), %s1384_s30, 1  ;;  %v1394_v0 = vmov (!%p424_p3), 0.0   ;;  %vm615_vm0 = vcmask (!%p424_p3), 1041408   ;;  %vm1016_vm6 = vcmask (!%p424_p3), 1040384  }
   0x7   : > { %427 = sbr.rel (%p424_p3) target bundleno = 343 (0x157), region = 56  ;;  %603 = vst [vmem:[#allocation2] sm:$0x3] (!%p424_p3), %v1394_v0  ;;  %604 = vst [vmem:[#allocation3] sm:$0x3] (!%p424_p3), %v1394_v0 }
   0xe   : > { %s1939_s30 = smov (!%p524_p4, %s1384_s30), 1 }
   0xf   : > { %s1468_s13 = sshll.u32 %s1939_s30, 3  ;;  %s1232_s20 = sshll.u32 %s1939_s30, 1 }
  0x10   : > { %s538_s16 = scalar_lea.vmem %s1925_s1, %s1468_s13  ;;  %s546_s19 = scalar_lea.vmem %s1926_s2, %s1468_s13 }
  0x11   : > { %v611_v1 = vld [vmem:[%s538_s16] sm:$0x3]  ;;  %v612_v2 = vld [vmem:[%s538_s16 + $0x2] sm:$0x3]  ;;  %v613_v3 = vld [vmem:[%s538_s16 + $0x4] sm:$0x3]  ;;  %s530_s23 = scalar_lea.vmem %s1924_s0, %s1232_s20  ;;  %s554_s26 = scalar_lea.vmem %s1927_s3, %s1468_s13 }
  0x12   : > { %v1478_v4 = vld [vmem:[%s538_s16 + $0x6] sm:$0x3]  ;;  %v616_v5 = vsel %vm615_vm0, %v611_v1, -inf  ;;  %v617_v6 = vsel %vm615_vm0, %v612_v2, -inf  ;;  %v618_v7 = vsel %vm615_vm0, %v613_v3, -inf  ;;  %s562_s29 = scalar_lea.vmem %s1928_s4, %s1468_s13  ;;  %s570_s16 = scalar_lea.vmem %s1929_s5, %s1468_s13 }
  0x13   : > { %v619_v8 = vsel %vm615_vm0, %v1478_v4, -inf  ;;  %v1485_v9 = vld [vmem:[%s546_s19] sm:$0x3]  ;;  %v1487_v10 = vld [vmem:[%s546_s19 + $0x2] sm:$0x3]  ;;  %v620_v13 = vmax.f32 %v616_v5, %v617_v6 }
  0x14   : > { %v1489_v11 = vld [vmem:[%s546_s19 + $0x4] sm:$0x3]  ;;  %v1491_v12 = vld [vmem:[%s546_s19 + $0x6] sm:$0x3]  ;;  %v621_v14 = vmax.f32 %v618_v7, %v619_v8  ;;  %v662_v15 = vsel %vm615_vm0, %v1485_v9, -inf  ;;  %v663_v16 = vsel %vm615_vm0, %v1487_v10, -inf  ;;  %s1634_s19 = scalar_lea.vmem %s1930_s6, %s1468_s13 }
  0x15   : > { %v664_v17 = vsel %vm615_vm0, %v1489_v11, -inf  ;;  %v665_v18 = vsel %vm615_vm0, %v1491_v12, -inf  ;;  %v666_v20 = vmax.f32 %v662_v15, %v663_v16  ;;  %v1513_v22 = vld [vmem:[%s530_s23] sm:$0x3]  ;;  %v1517_v24 = vld [vmem:[%s554_s26 + $0x2] sm:$0x3]  ;;  %s1687_s23 = scalar_lea.vmem %s1931_s7, %s1468_s13 }
  0x16   : > { %v1511_v19 = vmax.f32 %v620_v13, %v621_v14  ;;  %v667_v21 = vmax.f32 %v664_v17, %v665_v18  ;;  %v1515_v23 = vld [vmem:[%s554_s26] sm:$0x3]  ;;  %v1519_v25 = vld [vmem:[%s554_s26 + $0x4] sm:$0x3]  ;;  %v1521_v26 = vld [vmem:[%s554_s26 + $0x6] sm:$0x3]  ;;  %s1747_s26 = scalar_lea.vmem %s1932_s8, %s1468_s13 }
  0x17   : > { %vm607_vm1 = vcmp.eq.s32.totalorder %v1513_v22, 0  ;;  %v708_v29 = vsel %vm615_vm0, %v1515_v23, -inf  ;;  %v709_v30 = vsel %vm615_vm0, %v1517_v24, -inf  ;;  %v710_v31 = vsel %vm615_vm0, %v1519_v25, -inf  ;;  %v1540_v34 = vld [vmem:[%s562_s29] sm:$0x3] }
  0x18   : > { %v623_v27 = vsub.f32 %v611_v1, %v1511_v19  ;;  %v1529_v28 = vmax.f32 %v666_v20, %v667_v21  ;;  %v711_v32 = vsel %vm615_vm0, %v1521_v26, -inf  ;;  %v624_v33 = vsub.f32 %v612_v2, %v1511_v19  ;;  %v1542_v35 = vld [vmem:[%s562_s29 + $0x2] sm:$0x3]  ;;  %v1549_v40 = vld [vmem:[%s562_s29 + $0x4] sm:$0x3] }
  0x19   : > { %vm608_vm2 = vcmp.eq.s32.totalorder %v1513_v22, 1  ;;  %vm609_vm3 = vcmp.eq.s32.totalorder %v1513_v22, 2  ;;  %v625_v36 = vsub.f32 %v613_v3, %v1511_v19  ;;  %v645_v37 = vsel %vm607_vm1, %v611_v1, 0.0  ;;  %v1551_v41 = vld [vmem:[%s562_s29 + $0x6] sm:$0x3]  ;;  %s598_s29 = scalar_lea.vmem %s1933_s9, %s1232_s20 }
  0x1a   : > { %v712_v38 = vmax.f32 %v708_v29, %v709_v30  ;;  %v713_v39 = vmax.f32 %v710_v31, %v711_v32  ;;  %v627_v42 = vmul.f32 1.442695, %v623_v27  ;;  %v669_v43 = vsub.f32 %v1485_v9, %v1529_v28  ;;  %v1603_v16 = vld [vmem:[%s570_s16] sm:$0x3]  ;;  %v1607_v20 = vld [vmem:[%s570_s16 + $0x2] sm:$0x3] }
  0x1b   : > { %v754_v44 = vsel %vm615_vm0, %v1540_v34, -inf  ;;  %v755_v45 = vsel %vm615_vm0, %v1542_v35, -inf  ;;  %v629_v46 = vmul.f32 1.442695, %v624_v33  ;;  %v646_v47 = vsel %vm608_vm2, %v612_v2, 0.0 }
  0x1c   : > { %v670_v48 = vsub.f32 %v1487_v10, %v1529_v28  ;;  %vm610_vm4 = vcmp.eq.s32.totalorder %v1513_v22, 3  ;;  %v647_v49 = vsel %vm609_vm3, %v613_v3, 0.0  ;;  %v756_v50 = vsel %vm615_vm0, %v1549_v40, -inf  ;;  %v1609_v21 = vld [vmem:[%s570_s16 + $0x4] sm:$0x3] }
  0x1d   : > { %v757_v51 = vsel %vm615_vm0, %v1551_v41, -inf  ;;  %v631_v52 = vmul.f32 1.442695, %v625_v36  ;;  %v649_v53 = vsel %vm615_vm0, %v645_v37, 0.0  ;;  %v1571_v54 = vmax.f32 %v712_v38, %v713_v39  ;;  %v1614_v30 = vld [vmem:[%s570_s16 + $0x6] sm:$0x3] }
  0x1e   : > { %v758_v55 = vmax.f32 %v754_v44, %v755_v45  ;;  %v626_v56 = vsub.f32 %v1478_v4, %v1511_v19  ;;  %1290 = vpow2.f32 %v627_v42  ;;  %v650_v57 = vsel %vm615_vm0, %v646_v47, 0.0 }
  0x1f   : > { %v673_v58 = vmul.f32 1.442695, %v669_v43  ;;  %1292 = vpow2.f32 %v629_v46  ;;  %v671_v59 = vsub.f32 %v1489_v11, %v1529_v28  ;;  %v675_v60 = vmul.f32 1.442695, %v670_v48 }
  0x20   : > { %v759_v61 = vmax.f32 %v756_v50, %v757_v51  ;;  %v648_v62 = vsel %vm610_vm4, %v1478_v4, 0.0  ;;  %1294 = vpow2.f32 %v631_v52  ;;  %v652_v63 = vsel %vm615_vm0, %v647_v49, 0.0 }
  0x21   : > { %v715_v1 = vsub.f32 %v1515_v23, %v1571_v54  ;;  %v633_v3 = vmul.f32 1.442695, %v626_v56  ;;  %v651_v5 = vadd.f32 %v650_v57, %v649_v53  ;;  %1296 = vpow2.f32 %v673_v58 }
  0x22   : > { %v1588_v2 = vmax.f32 %v758_v55, %v759_v61  ;;  %v716_v6 = vsub.f32 %v1517_v24, %v1571_v54  ;;  %v672_v4 = vsub.f32 %v1491_v12, %v1529_v28  ;;  %1298 = vpow2.f32 %v675_v60 }
  0x23   : > { %v677_v7 = vmul.f32 1.442695, %v671_v59  ;;  %v717_v8 = vsub.f32 %v1519_v25, %v1571_v54  ;;  %v654_v13 = vsel %vm615_vm0, %v648_v62, 0.0  ;;  %v691_v14 = vsel %vm607_vm1, %v1485_v9, 0.0 }
  0x24   : > { %v692_v15 = vsel %vm608_vm2, %v1487_v10, 0.0  ;;  %v719_v17 = vmul.f32 1.442695, %v715_v1  ;;  %v761_v18 = vsub.f32 %v1540_v34, %v1588_v2  ;;  %1300 = vpow2.f32 %v633_v3  ;;  %v1654_v1 = vld [vmem:[%s1634_s19] sm:$0x3] }
  0x25   : > { %v653_v27 = vadd.f32 %v652_v63, %v651_v5  ;;  %v693_v9 = vsel %vm609_vm3, %v1489_v11, 0.0  ;;  %v721_v29 = vmul.f32 1.442695, %v716_v6  ;;  %1302 = vpow2.f32 %v677_v7  ;;  %v1659_v7 = vld [vmem:[%s1634_s19 + $0x2] sm:$0x3] }
  0x26   : > { %v679_v10 = vmul.f32 1.442695, %v672_v4  ;;  %v695_v31 = vsel %vm615_vm0, %v691_v14, 0.0  ;;  %v723_v32 = vmul.f32 1.442695, %v717_v8  ;;  %v762_v36 = vsub.f32 %v1542_v35, %v1588_v2 }
  0x27   : > { %v800_v37 = vsel %vm615_vm0, %v1603_v16, -inf  ;;  %v801_v38 = vsel %vm615_vm0, %v1607_v20, -inf  ;;  %v802_v11 = vsel %vm615_vm0, %v1609_v21, -inf  ;;  %1304 = vpow2.f32 %v719_v17 }
  0x28   : > { %v1291_v33 = vpop.eup %1290  ;;  %v765_v42 = vmul.f32 1.442695, %v761_v18  ;;  %v803_v43 = vsel %vm615_vm0, %v1614_v30, -inf  ;;  %v804_v44 = vmax.f32 %v800_v37, %v801_v38  ;;  %v696_v45 = vsel %vm615_vm0, %v692_v15, 0.0 }
  0x29   : > { %v1293_v39 = vpop.eup %1292  ;;  %v718_v46 = vsub.f32 %v1521_v26, %v1571_v54  ;;  %1306 = vpow2.f32 %v721_v29  ;;  %v805_v47 = vmax.f32 %v802_v11, %v803_v43  ;;  %v635_v49 = vsel %vm615_vm0, %v1291_v33, 0.0 }
  0x2a   : > { %v1295_v48 = vpop.eup %1294  ;;  %1308 = vpow2.f32 %v679_v10  ;;  %v694_v50 = vsel %vm610_vm4, %v1491_v12, 0.0  ;;  %v763_v51 = vsub.f32 %v1549_v40, %v1588_v2  ;;  %v636_v53 = vsel %vm615_vm0, %v1293_v39, 0.0  ;;  %v1670_v10 = vld [vmem:[%s1634_s19 + $0x4] sm:$0x3] }
  0x2b   : > { %v1297_v52 = vpop.eup %1296  ;;  %1310 = vpow2.f32 %v723_v32  ;;  %v767_v55 = vmul.f32 1.442695, %v762_v36  ;;  %v1643_v56 = vmax.f32 %v804_v44, %v805_v47  ;;  %v1645_v58 = vadd.f32 %v654_v13, %v653_v27  ;;  %v1676_v32 = vld [vmem:[%s1634_s19 + $0x6] sm:$0x3] }
  0x2c   : > { %v1299_v57 = vpop.eup %1298  ;;  %v697_v59 = vadd.f32 %v696_v45, %v695_v31  ;;  %v698_v60 = vsel %vm615_vm0, %v693_v9, 0.0  ;;  %1312 = vpow2.f32 %v765_v42  ;;  %v700_v12 = vsel %vm615_vm0, %v694_v50, 0.0 }
  0x2d   : > { %v725_v61 = vmul.f32 1.442695, %v718_v46  ;;  %v807_v62 = vsub.f32 %v1603_v16, %v1643_v56  ;;  %v808_v63 = vsub.f32 %v1607_v20, %v1643_v56  ;;  %v637_v3 = vadd.f32 %v636_v53, %v635_v49 }
  0x2e   : > { %v638_v5 = vsel %vm615_vm0, %v1295_v48, 0.0  ;;  %v681_v6 = vsel %vm615_vm0, %v1297_v52, 0.0  ;;  %v769_v4 = vmul.f32 1.442695, %v763_v51  ;;  %v1301_v8 = vpop.eup %1300  ;;  %v682_v13 = vsel %vm615_vm0, %v1299_v57, 0.0 }
  0x2f   : > { %v764_v14 = vsub.f32 %v1551_v41, %v1588_v2  ;;  %1314 = vpow2.f32 %v767_v55  ;;  %v811_v15 = vmul.f32 1.442695, %v807_v62  ;;  %v1303_v17 = vpop.eup %1302  ;;  %v699_v18 = vadd.f32 %v698_v60, %v697_v59 }
  0x30   : > { %v737_v27 = vsel %vm607_vm1, %v1515_v23, 0.0  ;;  %v809_v9 = vsub.f32 %v1609_v21, %v1643_v56  ;;  %v813_v29 = vmul.f32 1.442695, %v808_v63  ;;  %1316 = vpow2.f32 %v725_v61  ;;  %v1712_v63 = vld [vmem:[%s1687_s23 + $0x2] sm:$0x3] }
  0x31   : > { %v738_v31 = vsel %vm608_vm2, %v1517_v24, 0.0  ;;  %v846_v33 = vsel %vm615_vm0, %v1654_v1, -inf  ;;  %v847_v36 = vsel %vm615_vm0, %v1659_v7, -inf  ;;  %v1305_v23 = vpop.eup %1304  ;;  %v639_v37 = vadd.f32 %v638_v5, %v637_v3 }
  0x32   : > { %v640_v38 = vsel %vm615_vm0, %v1301_v8, 0.0  ;;  %v683_v11 = vadd.f32 %v682_v13, %v681_v6  ;;  %1318 = vpow2.f32 %v769_v4  ;;  %v771_v24 = vmul.f32 1.442695, %v764_v14  ;;  %v1718_v6 = vld [vmem:[%s1687_s23 + $0x4] sm:$0x3] }
  0x33   : > { %v1307_v39 = vpop.eup %1306  ;;  %v810_v42 = vsub.f32 %v1614_v30, %v1643_v56  ;;  %1320 = vpow2.f32 %v811_v15  ;;  %v848_v43 = vsel %vm615_vm0, %v1670_v10, -inf  ;;  %v815_v45 = vmul.f32 1.442695, %v809_v9  ;;  %v1721_v4 = vld [vmem:[%s1687_s23 + $0x6] sm:$0x3] }
  0x34   : > { %v1309_v44 = vpop.eup %1308  ;;  %1322 = vpow2.f32 %v813_v29  ;;  %v849_v46 = vsel %vm615_vm0, %v1676_v32, -inf  ;;  %v850_v47 = vmax.f32 %v846_v33, %v847_v36  ;;  %v684_v49 = vsel %vm615_vm0, %v1303_v17, 0.0 }
  0x35   : > { %v1311_v48 = vpop.eup %1310  ;;  %v1696_v50 = vadd.f32 %v700_v12, %v699_v18  ;;  %v739_v51 = vsel %vm609_vm3, %v1519_v25, 0.0  ;;  %v740_v52 = vsel %vm610_vm4, %v1521_v26, 0.0  ;;  %v727_v55 = vsel %vm615_vm0, %v1305_v23, 0.0  ;;  %v1708_v12 = vld [vmem:[%s1687_s23] sm:$0x3] }
  0x36   : > { %v1313_v53 = vpop.eup %1312  ;;  %v728_v57 = vsel %vm615_vm0, %v1307_v39, 0.0  ;;  %v741_v59 = vsel %vm615_vm0, %v737_v27, 0.0  ;;  %v851_v60 = vmax.f32 %v848_v43, %v849_v46  ;;  %v641_v61 = vadd.f32 %v640_v38, %v639_v37 }
  0x37   : > { %v742_v62 = vsel %vm615_vm0, %v738_v31, 0.0  ;;  %1324 = vpow2.f32 %v771_v24  ;;  %v817_v25 = vmul.f32 1.442695, %v810_v42  ;;  %v685_v26 = vadd.f32 %v684_v49, %v683_v11 }
  0x38   : > { %v686_v3 = vsel %vm615_vm0, %v1309_v44, 0.0  ;;  %1326 = vpow2.f32 %v815_v45  ;;  %v1715_v5 = vmax.f32 %v850_v47, %v851_v60  ;;  %v729_v13 = vadd.f32 %v728_v57, %v727_v55 }
  0x39   : > { %v1315_v8 = vpop.eup %1314  ;;  %v730_v14 = vsel %vm615_vm0, %v1311_v48, 0.0  ;;  %v773_v15 = vsel %vm615_vm0, %v1313_v53, 0.0  ;;  %v892_v17 = vsel %vm615_vm0, %v1708_v12, -inf  ;;  %1328 = vpow2.f32 %v817_v25 }
  0x3a   : > { %v853_v18 = vsub.f32 %v1654_v1, %v1715_v5  ;;  %v854_v27 = vsub.f32 %v1659_v7, %v1715_v5  ;;  %v855_v9 = vsub.f32 %v1670_v10, %v1715_v5  ;;  %v856_v29 = vsub.f32 %v1676_v32, %v1715_v5  ;;  %v1317_v31 = vpop.eup %1316 }
  0x3b   : > { %v893_v33 = vsel %vm615_vm0, %v1712_v63, -inf  ;;  %v894_v36 = vsel %vm615_vm0, %v1718_v6, -inf  ;;  %v895_v23 = vsel %vm615_vm0, %v1721_v4, -inf  ;;  %v774_v38 = vsel %vm615_vm0, %v1315_v8, 0.0 }
  0x3c   : > { %v1319_v37 = vpop.eup %1318  ;;  %v857_v11 = vmul.f32 1.442695, %v853_v18  ;;  %v859_v39 = vmul.f32 1.442695, %v854_v27  ;;  %v896_v24 = vmax.f32 %v892_v17, %v893_v33  ;;  %1330 = vlog2.f32 %v641_v61 }
  0x3d   : > { %v1321_v42 = vpop.eup %1320  ;;  %v731_v43 = vadd.f32 %v730_v14, %v729_v13  ;;  %v861_v44 = vmul.f32 1.442695, %v855_v9  ;;  %v863_v45 = vmul.f32 1.442695, %v856_v29  ;;  %v687_v47 = vadd.f32 %v686_v3, %v685_v26  ;;  %v1765_v14 = vld [vmem:[%s1747_s26] sm:$0x3] }
  0x3e   : > { %v1323_v46 = vpop.eup %1322  ;;  %v732_v48 = vsel %vm615_vm0, %v1317_v31, 0.0  ;;  %1332 = vpow2.f32 %v857_v11  ;;  %v897_v49 = vmax.f32 %v894_v36, %v895_v23  ;;  %v743_v53 = vadd.f32 %v742_v62, %v741_v59  ;;  %v1776_v9 = vld [vmem:[%s1747_s26 + $0x2] sm:$0x3]  ;;  %v1779_v29 = vld [vmem:[%s1747_s26 + $0x4] sm:$0x3] }
  0x3f   : > { %v744_v55 = vsel %vm615_vm0, %v739_v51, 0.0  ;;  %v775_v57 = vadd.f32 %v774_v38, %v773_v15  ;;  %1334 = vpow2.f32 %v859_v39  ;;  %v1751_v60 = vsel %vm615_vm0, %v740_v52, 0.0 }
  0x40   : > { %v776_v61 = vsel %vm615_vm0, %v1319_v37, 0.0  ;;  %1336 = vpow2.f32 %v861_v44  ;;  %v1754_v25 = vmax.f32 %v896_v24, %v897_v49  ;;  %v733_v3 = vadd.f32 %v732_v48, %v731_v43 }
  0x41   : > { %v1325_v26 = vpop.eup %1324  ;;  %v819_v8 = vsel %vm615_vm0, %v1321_v42, 0.0  ;;  %v820_v59 = vsel %vm615_vm0, %v1323_v46, 0.0  ;;  %1338 = vpow2.f32 %v863_v45  ;;  %v777_v15 = vadd.f32 %v776_v61, %v775_v57  ;;  %v1790_v42 = vld [vmem:[%s1747_s26 + $0x6] sm:$0x3] }
  0x42   : > { %v1327_v51 = vpop.eup %1326  ;;  %1340 = vlog2.f32 %v687_v47  ;;  %v899_v52 = vsub.f32 %v1708_v12, %v1754_v25  ;;  %v900_v62 = vsub.f32 %v1712_v63, %v1754_v25  ;;  %v901_v13 = vsub.f32 %v1718_v6, %v1754_v25 }
  0x43   : > { %v783_v17 = vsel %vm607_vm1, %v1540_v34, 0.0  ;;  %v784_v18 = vsel %vm608_vm2, %v1542_v35, 0.0  ;;  %v902_v27 = vsub.f32 %v1721_v4, %v1754_v25  ;;  %v778_v31 = vsel %vm615_vm0, %v1325_v26, 0.0  ;;  %v1329_v37 = vpop.eup %1328 }
  0x44   : > { %v821_v33 = vadd.f32 %v820_v59, %v819_v8  ;;  %v903_v36 = vmul.f32 1.442695, %v899_v52  ;;  %v905_v23 = vmul.f32 1.442695, %v900_v62  ;;  %1342 = vlog2.f32 %v733_v3 }
  0x45   : > { %v822_v34 = vsel %vm615_vm0, %v1327_v51, 0.0  ;;  %v907_v38 = vmul.f32 1.442695, %v901_v13  ;;  %v909_v11 = vmul.f32 1.442695, %v902_v27  ;;  %vm606_vm5 = vcmp.ne.s32.totalorder %v1513_v22, 0 }
  0x46   : > { %v785_v35 = vsel %vm609_vm3, %v1549_v40, 0.0  ;;  %v787_v39 = vsel %vm615_vm0, %v783_v17, 0.0  ;;  %v788_v24 = vsel %vm615_vm0, %v784_v18, 0.0  ;;  %1344 = vpow2.f32 %v903_v36  ;;  %v1331_v43 = vpop.eup %1330 }
  0x47   : > { %v779_v44 = vadd.f32 %v778_v31, %v777_v15  ;;  %1346 = vpow2.f32 %v905_v23  ;;  %v938_v45 = vsel %vm615_vm0, %v1765_v14, -inf  ;;  %v939_v46 = vsel %vm615_vm0, %v1776_v9, -inf }
  0x48   : > { %v1333_v47 = vpop.eup %1332  ;;  %v823_v48 = vadd.f32 %v822_v34, %v821_v33  ;;  %v824_v40 = vsel %vm615_vm0, %v1329_v37, 0.0  ;;  %1348 = vpow2.f32 %v907_v38  ;;  %v940_v49 = vsel %vm615_vm0, %v1779_v29, -inf  ;;  %v984_v34 = vld [vmem:[#allocation3] sm:$0x3] }
  0x49   : > { %v1335_v57 = vpop.eup %1334  ;;  %v865_v61 = vsel %vm615_vm0, %v1333_v47, 0.0  ;;  %1350 = vpow2.f32 %v909_v11  ;;  %v941_v26 = vsel %vm615_vm0, %v1790_v42, -inf  ;;  %v942_v3 = vmax.f32 %v938_v45, %v939_v46 }
  0x4a   : > { %v1337_v8 = vpop.eup %1336  ;;  %v745_v59 = vadd.f32 %v744_v55, %v743_v53  ;;  %v786_v51 = vsel %vm610_vm4, %v1551_v41, 0.0  ;;  %v866_v52 = vsel %vm615_vm0, %v1335_v57, 0.0  ;;  %v943_v62 = vmax.f32 %v940_v49, %v941_v26 }
  0x4b   : > { %v1339_v13 = vpop.eup %1338  ;;  %v789_v15 = vadd.f32 %v788_v24, %v787_v39  ;;  %v790_v17 = vsel %vm615_vm0, %v785_v35, 0.0  ;;  %v867_v18 = vadd.f32 %v866_v52, %v865_v61  ;;  %v868_v27 = vsel %vm615_vm0, %v1337_v8, 0.0 }
  0x4c   : > { %v1341_v31 = vpop.eup %1340  ;;  %1352 = vlog2.f32 %v779_v44  ;;  %v825_v33 = vadd.f32 %v824_v40, %v823_v48  ;;  %v870_v36 = vsel %vm615_vm0, %v1339_v13, 0.0  ;;  %v1809_v53 = vmax.f32 %v942_v3, %v943_v62 }
  0x4d   : > { %v829_v41 = vsel %vm607_vm1, %v1603_v16, 0.0  ;;  %v830_v55 = vsel %vm608_vm2, %v1607_v20, 0.0  ;;  %v831_v23 = vsel %vm609_vm3, %v1609_v21, 0.0  ;;  %v869_v37 = vadd.f32 %v868_v27, %v867_v18 }
  0x4e   : > { %v945_v38 = vsub.f32 %v1765_v14, %v1809_v53  ;;  %v946_v11 = vsub.f32 %v1776_v9, %v1809_v53  ;;  %v947_v35 = vsub.f32 %v1779_v29, %v1809_v53  ;;  %v948_v16 = vsub.f32 %v1790_v42, %v1809_v53  ;;  %v1343_v39 = vpop.eup %1342 }
  0x4f   : > { %v643_v20 = vmul.f32 0.6931472, %v1331_v43  ;;  %v689_v24 = vmul.f32 0.6931472, %v1341_v31  ;;  %v871_v44 = vadd.f32 %v870_v36, %v869_v37  ;;  %v1250_v21 = vsel %vm606_vm5, 1.0, %v1394_v0 }
  0x50   : > { %v1345_v45 = vpop.eup %1344  ;;  %1354 = vlog2.f32 %v825_v33  ;;  %v949_v46 = vmul.f32 1.442695, %v945_v38  ;;  %v951_v47 = vmul.f32 1.442695, %v946_v11  ;;  %v987_v48 = vadd.f32 %v1250_v21, %v984_v34 }
  0x51   : > { %v1347_v40 = vpop.eup %1346  ;;  %1356 = vlog2.f32 %v871_v44  ;;  %v911_v49 = vsel %vm615_vm0, %v1345_v45, 0.0  ;;  %v953_v57 = vmul.f32 1.442695, %v947_v35  ;;  %v955_v61 = vmul.f32 1.442695, %v948_v16 }
  0x52   : > { %v1349_v26 = vpop.eup %1348  ;;  %v833_v43 = vsel %vm615_vm0, %v829_v41, 0.0  ;;  %v834_v3 = vsel %vm615_vm0, %v830_v55, 0.0  ;;  %v912_v8 = vsel %vm615_vm0, %v1347_v40, 0.0  ;;  %1358 = vpow2.f32 %v949_v46  ;;  %988 = vst [vmem:[#allocation3] sm:$0x3] %v987_v48 }
  0x53   : > { %v1351_v0 = vpop.eup %1350  ;;  %v644_v52 = vadd.f32 %v643_v20, %v1511_v19  ;;  %v913_v62 = vadd.f32 %v912_v8, %v911_v49  ;;  %v914_v13 = vsel %vm615_vm0, %v1349_v26, 0.0  ;;  %1360 = vpow2.f32 %v951_v47 }
  0x54   : > { %v690_v18 = vadd.f32 %v689_v24, %v1529_v28  ;;  %v735_v27 = vmul.f32 0.6931472, %v1343_v39  ;;  %v916_v31 = vsel %vm615_vm0, %v1351_v0, 0.0  ;;  %1362 = vpow2.f32 %v953_v57 }
  0x55   : > { %v747_v33 = vadd.f32 %v1751_v60, %v745_v59  ;;  %v915_v36 = vadd.f32 %v914_v13, %v913_v62  ;;  %1364 = vpow2.f32 %v955_v61  ;;  %v791_v55 = vadd.f32 %v790_v17, %v789_v15 }
  0x56   : > { %v1353_v41 = vpop.eup %1352  ;;  %v792_v37 = vsel %vm615_vm0, %v786_v51, 0.0  ;;  %v875_v19 = vsel %vm607_vm1, %v1654_v1, 0.0  ;;  %v876_v28 = vsel %vm608_vm2, %v1659_v7, 0.0  ;;  %v832_v34 = vsel %vm610_vm4, %v1614_v30, 0.0 }
  0x57   : > { %v835_v38 = vadd.f32 %v834_v3, %v833_v43  ;;  %v836_v60 = vsel %vm615_vm0, %v831_v23, 0.0  ;;  %v917_v59 = vadd.f32 %v916_v31, %v915_v36  ;;  %v656_v15 = vsub.f32 %v644_v52, %v1645_v58 }
  0x58   : > { %v702_v51 = vsub.f32 %v690_v18, %v1696_v50  ;;  %v736_v17 = vadd.f32 %v735_v27, %v1571_v54  ;;  %v877_v1 = vsel %vm609_vm3, %v1670_v10, 0.0  ;;  %v781_v11 = vmul.f32 0.6931472, %v1353_v41 }
  0x59   : > { %v879_v7 = vsel %vm615_vm0, %v875_v19, 0.0  ;;  %v880_v35 = vsel %vm615_vm0, %v876_v28, 0.0  ;;  %1366 = vlog2.f32 %v917_v59  ;;  %v921_v23 = vsel %vm607_vm1, %v1708_v12, 0.0 }
  0x5a   : > { %v1355_v30 = vpop.eup %1354  ;;  %v922_v58 = vsel %vm608_vm2, %v1712_v63, 0.0  ;;  %v793_v50 = vadd.f32 %v792_v37, %v791_v55  ;;  %v837_v16 = vadd.f32 %v836_v60, %v835_v38  ;;  %v838_v10 = vsel %vm615_vm0, %v832_v34, 0.0 }
  0x5b   : > { %v1357_v54 = vpop.eup %1356  ;;  %v878_v39 = vsel %vm610_vm4, %v1676_v32, 0.0  ;;  %v703_v24 = vadd.f32 %v702_v51, %v656_v15  ;;  %v748_v44 = vsub.f32 %v736_v17, %v747_v33  ;;  %v881_v21 = vadd.f32 %v880_v35, %v879_v7 }
  0x5c   : > { %v1359_v20 = vpop.eup %1358  ;;  %v882_v45 = vsel %vm615_vm0, %v877_v1, 0.0  ;;  %v782_v46 = vadd.f32 %v781_v11, %v1588_v2  ;;  %v925_v63 = vsel %vm615_vm0, %v921_v23, 0.0  ;;  %v926_v47 = vsel %vm615_vm0, %v922_v58, 0.0 }
  0x5d   : > { %v1361_v12 = vpop.eup %1360  ;;  %v957_v48 = vsel %vm615_vm0, %v1359_v20, 0.0  ;;  %v827_v49 = vmul.f32 0.6931472, %v1355_v30  ;;  %v923_v32 = vsel %vm609_vm3, %v1718_v6, 0.0  ;;  %v839_v26 = vadd.f32 %v838_v10, %v837_v16 }
  0x5e   : > { %v1363_v40 = vpop.eup %1362  ;;  %v958_v57 = vsel %vm615_vm0, %v1361_v12, 0.0  ;;  %v884_v43 = vsel %vm615_vm0, %v878_v39, 0.0  ;;  %v749_v8 = vadd.f32 %v748_v44, %v703_v24  ;;  %v883_v0 = vadd.f32 %v882_v45, %v881_v21  ;;  %v980_v24 = vld [vmem:[#allocation2] sm:$0x3]  ;;  %v1003_v21 = vld [vmem:[#allocation3] sm:$0x3] }
  0x5f   : > { %v1365_v61 = vpop.eup %1364  ;;  %v959_v3 = vadd.f32 %v958_v57, %v957_v48  ;;  %v960_v2 = vsel %vm615_vm0, %v1363_v40, 0.0  ;;  %v927_v52 = vadd.f32 %v926_v47, %v925_v63  ;;  %v794_v13 = vsub.f32 %v782_v46, %v793_v50 }
  0x60   : > { %v962_v62 = vsel %vm615_vm0, %v1365_v61, 0.0  ;;  %v924_v18 = vsel %vm610_vm4, %v1721_v4, 0.0  ;;  %v928_v6 = vsel %vm615_vm0, %v923_v32, 0.0  ;;  %v828_v31 = vadd.f32 %v827_v49, %v1643_v56 }
  0x61   : > { %v961_v27 = vadd.f32 %v960_v2, %v959_v3  ;;  %v873_v33 = vmul.f32 0.6931472, %v1357_v54  ;;  %v967_v36 = vsel %vm607_vm1, %v1765_v14, 0.0  ;;  %v968_v41 = vsel %vm608_vm2, %v1776_v9, 0.0 }
  0x62   : > { %v885_v19 = vadd.f32 %v884_v43, %v883_v0  ;;  %v929_v28 = vadd.f32 %v928_v6, %v927_v52  ;;  %v930_v4 = vsel %vm615_vm0, %v924_v18, 0.0  ;;  %v795_v34 = vadd.f32 %v794_v13, %v749_v8 }
  0x63   : > { %v1367_v55 = vpop.eup %1366  ;;  %v963_v37 = vadd.f32 %v962_v62, %v961_v27  ;;  %v971_v38 = vsel %vm615_vm0, %v967_v36, 0.0  ;;  %v972_v56 = vsel %vm615_vm0, %v968_v41, 0.0  ;;  %v840_v60 = vsub.f32 %v828_v31, %v839_v26 }
  0x64   : > { %v874_v59 = vadd.f32 %v873_v33, %v1715_v5  ;;  %v919_v14 = vmul.f32 0.6931472, %v1367_v55  ;;  %v969_v9 = vsel %vm609_vm3, %v1779_v29, 0.0  ;;  %v973_v15 = vadd.f32 %v972_v56, %v971_v38 }
  0x65   : > { %1368 = vlog2.f32 %v963_v37  ;;  %v931_v51 = vadd.f32 %v930_v4, %v929_v28  ;;  %v974_v17 = vsel %vm615_vm0, %v969_v9, 0.0  ;;  %v841_v1 = vadd.f32 %v840_v60, %v795_v34 }
  0x66   : > { %v886_v11 = vsub.f32 %v874_v59, %v885_v19  ;;  %v920_v7 = vadd.f32 %v919_v14, %v1754_v25  ;;  %v970_v35 = vsel %vm610_vm4, %v1790_v42, 0.0  ;;  %v975_v30 = vadd.f32 %v974_v17, %v973_v15 }
  0x67   : > { %v976_v5 = vsel %vm615_vm0, %v970_v35, 0.0  ;;  %v1004_v12 = vsel %vm615_vm0, %v1003_v21, 0.0 }
  0x68   : > { %v887_v23 = vadd.f32 %v886_v11, %v841_v1  ;;  %v932_v58 = vsub.f32 %v920_v7, %v931_v51  ;;  %v977_v29 = vadd.f32 %v976_v5, %v975_v30 }
  0x6a   : > { %v933_v16 = vadd.f32 %v932_v58, %v887_v23 }
  0x6f   : > { %v1369_v54 = vpop.eup %1368 }
  0x70   : > { %v965_v50 = vmul.f32 0.6931472, %v1369_v54 }
  0x72   : > { %v966_v10 = vadd.f32 %v965_v50, %v1809_v53 }
  0x74   : > { %v978_v39 = vsub.f32 %v966_v10, %v977_v29 }
  0x76   : > { %v979_v20 = vadd.f32 %v978_v39, %v933_v16 }
  0x78   : > { %v981_v25 = vsel %vm606_vm5, %v979_v20, 0.0 }
  0x79   : > { %v982_v44 = vadd.f32 %v981_v25, %v980_v24 }
  0x7b   : > { %983 = vst [vmem:[#allocation2] sm:$0x3] %v982_v44 }
  0x82   : > { %v992_v42 = vld [vmem:[#allocation2] sm:$0x3] }
  0x83   : > { %v993_v45 = vsel %vm615_vm0, %v992_v42, 0.0 }
  0x84   : > { %994 = vadd.xlane.f32.xlu0 %v993_v45 }
  0x88   : > { %1005 = vadd.xlane.f32.xlu0 %v1004_v12 }
 0x111   : > { %v995_v46 = vpop.xlane.xlu0 %994 }
 0x112   : > { %v996_v63 = vrot.slane %v995_v46, 4 }
 0x114   : > { %v997_v47 = vadd.f32 %v996_v63, %v995_v46 }
 0x115   : > { %v1006_v53 = vpop.xlane.xlu0 %1005 }
 0x116   : > { %v998_v48 = vrot.slane %v997_v47, 2  ;;  %v1007_v40 = vrot.slane %v1006_v53, 4 }
 0x118   : > { %v1008_v49 = vadd.f32 %v1007_v40, %v1006_v53  ;;  %v999_v22 = vadd.f32 %v998_v48, %v997_v47 }
 0x11a   : > { %v1009_v32 = vrot.slane %v1008_v49, 2  ;;  %v1000_v57 = vrot.slane %v999_v22, 1 }
 0x11c   : > { %v1010_v61 = vadd.f32 %v1009_v32, %v1008_v49  ;;  %v1001_v26 = vadd.f32 %v1000_v57, %v999_v22 }
 0x11e   : > { %1261 = vpush %v1001_v26  ;;  %v1011_v43 = vrot.slane %v1010_v61, 1 }
 0x120   : > { %v1012_v3 = vadd.f32 %v1011_v43, %v1010_v61 }
 0x122   : > { %1263 = vpush %v1012_v3 }
 0x14f   : > { %s1262_s13 = spop %1261 }
 0x150   : > { %v1014_v2 = vstv %s1262_s13 }
 0x153   : > { %s1264_s14 = spop %1263 }
 0x154   : > { %v1015_v8 = vstv %s1264_s14 }
 0x155   : > { %v1017_v0 = vsel %vm1016_vm6, %v1014_v2, %v1015_v8 }
 0x156   : > { %1018 = vst [vmem:[%s598_s29] sm:$0x3] %v1017_v0 }
 0x157 PF: > { %s19_s11 = sadd.s32 1, %s1392_s11   ;;  %s1934_s30 = smov %s1388_s10 }
 0x158   : > { %p16_p5 = scmp.ge.s32.totalorder %s19_s11, 4   ;;  %s1935_s10 = smov %s1937_s12 }
 0x15a   :  { %18 = sbr.rel (!%p16_p5) target bundleno = 2 (0x2), region = 118 }

</bundles_post_ra>
